<compile_context>
chip_gen: v7x
topology: tpu7x:2x2x1
jax: 0.10.0
libtpu: 0.0.40
codegen_flags: <defaults>
</compile_context>

<pallas_src>
import jax
import jax.numpy as jnp
from jax.experimental import pallas as pl
from jax.experimental.pallas import tpu as pltpu


# --------------------------------------------------------------- ActNorm + InvConv2dLU
def actnorm_invconv(x_nchw, wc):
    """ActNorm (data-dependent init, like the reference's first call) fused with the
    InvConv2dLU 1x1 conv.  Returns (act_cm, w_cm, logdet_act); the first two are
    (C, N*H*W) channel-major (spatial on the lane axis)."""
    N, C, H, W = x_nchw.shape
    HW = H * W
    M = N * HW
    x_cm = jnp.transpose(x_nchw, (1, 0, 2, 3)).reshape(C, M)

    # ---- pass 1: per-channel sum / sum-of-squares, tiled over M (reduction) ----
    def stats_kernel(x_ref, stat_ref):
        @pl.when(pl.program_id(0) == 0)
        def _():
            stat_ref[...] = jnp.zeros_like(stat_ref)
        x = x_ref[...]
        s = jnp.sum(x, axis=1, keepdims=True)
        q = jnp.sum(x * x, axis=1, keepdims=True)
        stat_ref[...] += jnp.concatenate([s, q], axis=1)

    stats = pl.pallas_call(
        stats_kernel,
        grid=(N,),
        in_specs=[pl.BlockSpec((C, HW), lambda j: (0, j))],
        out_specs=pl.BlockSpec((C, 2), lambda j: (0, 0)),
        out_shape=jax.ShapeDtypeStruct((C, 2), jnp.float32),
        compiler_params=pltpu.CompilerParams(dimension_semantics=("arbitrary",)),
    )(x_cm)

    # tiny (C,)-sized glue: mean / unbiased std -> scale, and the ActNorm logdet.
    mean = stats[:, 0] / M
    var = (stats[:, 1] - M * mean * mean) / (M - 1)      # torch unbiased std
    scale = 1.0 / (jnp.sqrt(var) + 1e-6)
    logdet_act = float(HW) * jnp.sum(jnp.log(jnp.abs(scale)))
    ms = jnp.stack([mean, scale], axis=1)                # (C, 2)

    # ---- pass 2: normalize + 1x1 InvConv matmul, tiled over M ('parallel') ----
    def norm_kernel(x_ref, ms_ref, wc_ref, act_ref, w_ref):
        a = ms_ref[:, 1:2] * (x_ref[...] - ms_ref[:, 0:1])
        act_ref[...] = a
        w_ref[...] = jnp.dot(wc_ref[...], a, preferred_element_type=jnp.float32)

    act_cm, w_cm = pl.pallas_call(
        norm_kernel,
        grid=(N,),
        in_specs=[pl.BlockSpec((C, HW), lambda j: (0, j)),
                  pl.BlockSpec((C, 2), lambda j: (0, 0)),
                  pl.BlockSpec((C, C), lambda j: (0, 0))],
        out_specs=[pl.BlockSpec((C, HW), lambda j: (0, j)),
                   pl.BlockSpec((C, HW), lambda j: (0, j))],
        out_shape=[jax.ShapeDtypeStruct((C, M), jnp.float32),
                   jax.ShapeDtypeStruct((C, M), jnp.float32)],
        compiler_params=pltpu.CompilerParams(dimension_semantics=("parallel",)),
    )(x_cm, ms, wc)
    return act_cm, w_cm, logdet_act


# --------------------------------------------------------------- fused coupling network
def coupling_net(w_cm, w0_2d, w2_2d, wz_taps, bias_mat, N, C, H, W):
    """AffineCoupling net + coupling math, fused.  Input w_cm is (C, N*H*W) channel-major.
    Returns out_b (C//2, N*H*W) channel-major and det2 (N,)."""
    C2 = C // 2
    F = w0_2d.shape[0]
    HW = H * W
    PADW = W + 1          # spatial halo (one image row + 1) each side of the flat axis

    def kernel(wa_ref, w0_ref, w2_ref, wz_ref, b_ref, outb_ref, det_ref,
               pada_ref, padh_ref):
        in_a = wa_ref[0:C2, :]                       # (C2, HW)
        in_b = wa_ref[C2:C, :]                       # (C2, HW)

        # in-bounds masks for 3x3 taps (flattened local index m = y*W + x)
        col = jax.lax.broadcasted_iota(jnp.int32, (1, HW), 1)
        xpos = col % W
        ypos = col // W

        def tap(pad_ref, dy, dx, pad_value):
            # value at output (y, x) = src[y+dy, x+dx], or pad_value outside the image.
            start = PADW + dy * W + dx               # static python int, >= 0
            slab = pad_ref[:, start:start + HW]
            ok = ((xpos + dx >= 0) & (xpos + dx < W) &
                  (ypos + dy >= 0) & (ypos + dy < H))
            return jnp.where(ok, slab, pad_value)

        # ---- conv0: 3x3, zero pad, as a single K = 9*C2 GEMM (in-VMEM tap gather) ----
        pada_ref[...] = jnp.concatenate(
            [jnp.zeros((C2, PADW), jnp.float32), in_a,
             jnp.zeros((C2, PADW), jnp.float32)], axis=1)
        patch = jnp.concatenate(
            [tap(pada_ref, kh - 1, kw - 1, 0.0)
             for kh in range(3) for kw in range(3)], axis=0)      # (9*C2, HW)
        h1 = jnp.dot(w0_ref[...], patch, preferred_element_type=jnp.float32)
        h1 = jnp.maximum(h1 + b_ref[:, 0:1], 0.0)                 # (F, HW)

        # ---- conv2: 1x1 ----
        h2 = jnp.dot(w2_ref[...], h1, preferred_element_type=jnp.float32)
        h2 = jnp.maximum(h2 + b_ref[:, 1:2], 0.0)                 # (F, HW)

        # ---- ZeroConv2d: 3x3, pad value 1.0, 9-tap shifted accumulation ----
        padh_ref[...] = jnp.concatenate(
            [jnp.full((F, PADW), 1.0, jnp.float32), h2,
             jnp.full((F, PADW), 1.0, jnp.float32)], axis=1)
        net = jnp.zeros((C, HW), jnp.float32)
        for kh in range(3):
            for kw in range(3):
                slab = tap(padh_ref, kh - 1, kw - 1, 1.0)         # (F, HW)
                net = net + jnp.dot(wz_ref[kh * 3 + kw], slab,
                                    preferred_element_type=jnp.float32)
        net = net + b_ref[0:C, 2:3]          # bias*colscale (colscale folded into wz)

        # ---- affine coupling ----
        log_s = net[0:C2, :]
        t = net[C2:C, :]
        s = jax.nn.sigmoid(log_s + 2.0)
        outb_ref[...] = (in_b + t) * s                            # lane-dense (C2, HW)
        # per-sample logdet written as one full (8,128) tile (unmasked store);
        # the scalar is picked out in JAX.
        det_ref[...] = jnp.full((1, 8, 128), jnp.sum(jnp.log(s)), jnp.float32)

    out_b_cm, det_blk = pl.pallas_call(
        kernel,
        grid=(N,),
        in_specs=[pl.BlockSpec((C, HW), lambda n: (0, n)),
                  pl.BlockSpec((F, 9 * C2), lambda n: (0, 0)),
                  pl.BlockSpec((F, F), lambda n: (0, 0)),
                  pl.BlockSpec((9, C, F), lambda n: (0, 0, 0)),
                  pl.BlockSpec((F, 3), lambda n: (0, 0))],
        out_specs=[pl.BlockSpec((C2, HW), lambda n: (0, n)),
                   pl.BlockSpec((1, 8, 128), lambda n: (n, 0, 0))],
        out_shape=[jax.ShapeDtypeStruct((C2, N * HW), jnp.float32),
                   jax.ShapeDtypeStruct((N, 8, 128), jnp.float32)],
        scratch_shapes=[pltpu.VMEM((C2, HW + 2 * PADW), jnp.float32),
                        pltpu.VMEM((F, HW + 2 * PADW), jnp.float32)],
        compiler_params=pltpu.CompilerParams(dimension_semantics=("parallel",)),
    )(w_cm, w0_2d, w2_2d, wz_taps, bias_mat)
    return out_b_cm, det_blk[:, 0, 0]


# --------------------------------------------------------------- parameters / glue
def calc_inv_weight(p):
    C = p["w_l"].shape[0]
    l = p["w_l"] * p["l_mask"] + jnp.eye(C, dtype=jnp.float32)
    u = p["w_u"] * p["u_mask"] + jnp.diag(p["s_sign"] * jnp.exp(p["w_s"]))
    return p["w_p"] @ l @ u  # (Cout, Cin)


def init_flow_params(key, in_channel, filter_size=512):
    C = in_channel
    ks = jax.random.split(key, 6)
    # InvConv2dLU: QR of a random matrix, then LU factorization (parameter-only glue)
    w = jax.random.normal(ks[0], (C, C), jnp.float32)
    q, _ = jnp.linalg.qr(w)
    P, L, U = jax.scipy.linalg.lu(q)
    w_s_diag = jnp.diag(U)
    return dict(
        w_p=P, w_l=L, w_u=jnp.triu(U, 1),
        s_sign=jnp.sign(w_s_diag), w_s=jnp.log(jnp.abs(w_s_diag)),
        l_mask=jnp.tril(jnp.ones((C, C), jnp.float32), -1),
        u_mask=jnp.triu(jnp.ones((C, C), jnp.float32), 1),
        # AffineCoupling net
        w0=jax.random.normal(ks[1], (filter_size, C // 2, 3, 3), jnp.float32) * 0.05,
        b0=jnp.zeros((filter_size,), jnp.float32),
        w2=jax.random.normal(ks[2], (filter_size, filter_size, 1, 1), jnp.float32) * 0.05,
        b2=jnp.zeros((filter_size,), jnp.float32),
        # ZeroConv2d (reference zero-inits these; small deterministic values used so the
        # ZeroConv path is actually exercised)
        wz=jax.random.normal(ks[3], (C, filter_size, 3, 3), jnp.float32) * 0.01,
        bz=jax.random.normal(ks[4], (C,), jnp.float32) * 0.01,
        scale_z=jax.random.normal(ks[5], (C,), jnp.float32) * 0.01,
    )


def flow_forward(params, x):
    N, C, H, W = x.shape
    C2 = C // 2
    F = params["w0"].shape[0]

    # --- ActNorm + InvConv2dLU (fused, channel-major) ---
    wc = calc_inv_weight(params)                               # (C, C) parameter glue
    act_cm, w_cm, logdet_act = actnorm_invconv(x, wc)
    det1 = float(H * W) * jnp.sum(params["w_s"])

    # --- AffineCoupling network (single fused kernel, one grid step per sample) ---
    # parameter-only reshapes; ZeroConv2d colscale exp(scale*3) folded into weights/bias
    w0_2d = params["w0"].transpose(0, 2, 3, 1).reshape(F, 9 * C2)          # (F, 9*C2)
    w2_2d = params["w2"][:, :, 0, 0]                                       # (F, F)
    cs = jnp.exp(params["scale_z"] * 3.0)                                  # (C,)
    wz_taps = (params["wz"] * cs[:, None, None, None]
               ).transpose(2, 3, 0, 1).reshape(9, C, F)                    # (9, C, F)
    bias_mat = jnp.zeros((F, 3), jnp.float32)
    bias_mat = bias_mat.at[:, 0].set(params["b0"])
    bias_mat = bias_mat.at[:, 1].set(params["b2"])
    bias_mat = bias_mat.at[:C, 2].set(params["bz"] * cs)

    out_b_cm, det2 = coupling_net(w_cm, w0_2d, w2_2d, wz_taps, bias_mat, N, C, H, W)

    # --- back to NCHW only for the returned tensors (tiny, C<=4 channel transposes) ---
    act_out = act_cm.reshape(C, N, H, W).transpose(1, 0, 2, 3)
    w_out = w_cm.reshape(C, N, H, W).transpose(1, 0, 2, 3)
    out_b = out_b_cm.reshape(C2, N, H, W).transpose(1, 0, 2, 3)
    out = jnp.concatenate([w_out[:, :C2], out_b], axis=1)
    logdet = logdet_act + det1 + det2                          # shape (N,)
    return act_out, w_out, out, logdet


# --------------------------------------------------------------- pure-JAX reference
def flow_reference(params, x):
    N, C, H, W = x.shape
    C2 = C // 2
    dn = ("NCHW", "OIHW", "NCHW")
    flat = x.transpose(1, 0, 2, 3).reshape(C, -1)
    mean = flat.mean(axis=1)
    std = jnp.sqrt(jnp.sum((flat - mean[:, None]) ** 2, axis=1) / (flat.shape[1] - 1))
    scale = (1.0 / (std + 1e-6)).reshape(1, C, 1, 1)
    act_out = scale * (x - mean.reshape(1, C, 1, 1))
    logdet = H * W * jnp.sum(jnp.log(jnp.abs(scale)))
    wc = calc_inv_weight(params)
    w_out = jax.lax.conv_general_dilated(act_out, wc[:, :, None, None], (1, 1), "VALID",
                                         dimension_numbers=dn)
    det1 = H * W * jnp.sum(params["w_s"])
    in_a, in_b = w_out[:, :C2], w_out[:, C2:]
    h = jax.lax.conv_general_dilated(in_a, params["w0"], (1, 1), [(1, 1), (1, 1)],
                                     dimension_numbers=dn) + params["b0"].reshape(1, -1, 1, 1)
    h = jnp.maximum(h, 0.0)
    h = jax.lax.conv_general_dilated(h, params["w2"], (1, 1), "VALID",
                                     dimension_numbers=dn) + params["b2"].reshape(1, -1, 1, 1)
    h = jnp.maximum(h, 0.0)
    hp = jnp.pad(h, ((0, 0), (0, 0), (1, 1), (1, 1)), constant_values=1.0)
    net_out = jax.lax.conv_general_dilated(hp, params["wz"], (1, 1), "VALID",
                                           dimension_numbers=dn) + params["bz"].reshape(1, -1, 1, 1)
    net_out = net_out * jnp.exp(params["scale_z"].reshape(1, -1, 1, 1) * 3.0)
    log_s, t = net_out[:, :C2], net_out[:, C2:]
    s = jax.nn.sigmoid(log_s + 2.0)
    out_b = (in_b + t) * s
    det2 = jnp.sum(jnp.log(s).reshape(N, -1), axis=1)
    out = jnp.concatenate([in_a, out_b], axis=1)
    return act_out, w_out, out, logdet + det1 + det2


if __name__ == "__main__":
    key = jax.random.PRNGKey(0)
    kx, kp = jax.random.split(key)
    N, C, H, W = 2, 4, 16, 16
    x = jax.random.normal(kx, (N, C, H, W), jnp.float32)
    params = init_flow_params(kp, C, filter_size=512)

    result = jax.block_until_ready(flow_forward(params, x))
    ref = flow_reference(params, x)
    for got, want in zip(result, ref):
        assert got.shape == want.shape, (got.shape, want.shape)
        assert jnp.allclose(got, want, rtol=2e-3, atol=2e-3), float(jnp.max(jnp.abs(got - want)))
    print("KERNEL_OK")
</pallas_src>

<mosaic_0001>
module attributes {stable_mosaic.version = 11 : i64} {
  func.func @stats_kernel(%arg0: i32, %arg1: memref<4x256xf32, #tpu.memory_space<vmem>>, %arg2: memref<4x2xf32, #tpu.memory_space<vmem>>) attributes {dimension_semantics = [#tpu.dimension_semantics<arbitrary>], iteration_bounds = array<i64: 2>, scalar_prefetch = 0 : i64, scratch_operands = 0 : i64, tpu.core_type = #tpu.core_type<tc>, window_params = [{transform_indices = @transform_0, window_bounds = array<i64: 4, 256>}, {pipeline_mode = #tpu.pipeline_mode<synchronous>, transform_indices = @transform_1, window_bounds = array<i64: 4, 2>}]} {
    %c0_i32 = arith.constant 0 : i32
    %0 = arith.cmpi eq, %arg0, %c0_i32 : i32
    %1 = arith.extui %0 : i1 to i32
    %c0_i32_0 = arith.constant 0 : i32
    %2 = arith.cmpi ne, %1, %c0_i32_0 : i32
    scf.if %2 {
      %cst_7 = arith.constant 0.000000e+00 : f32
      %13 = vector.broadcast %cst_7 : f32 to vector<4x2xf32>
      %c0_8 = arith.constant 0 : index
      %c0_9 = arith.constant 0 : index
      %14 = vector.load %arg2[%c0_8, %c0_9] : memref<4x2xf32, #tpu.memory_space<vmem>>, vector<4x2xf32>
      tpu.vector_store %arg2[%c0_8, %c0_9], %13 {strides = array<i32>} : memref<4x2xf32, #tpu.memory_space<vmem>>, vector<4x2xf32>,
    } else {
    }
    %c0 = arith.constant 0 : index
    %c0_1 = arith.constant 0 : index
    %3 = vector.load %arg1[%c0, %c0_1] : memref<4x256xf32, #tpu.memory_space<vmem>>, vector<4x256xf32>
    %cst = arith.constant dense<0.000000e+00> : vector<4xf32>
    %4 = vector.multi_reduction <add>, %3, %cst [1] : vector<4x256xf32> to vector<4xf32>
    %5 = vector.shape_cast %4 : vector<4xf32> to vector<4x1xf32>
    %6 = arith.mulf %3, %3 : vector<4x256xf32>
    %cst_2 = arith.constant dense<0.000000e+00> : vector<4xf32>
    %7 = vector.multi_reduction <add>, %6, %cst_2 [1] : vector<4x256xf32> to vector<4xf32>
    %8 = vector.shape_cast %7 : vector<4xf32> to vector<4x1xf32>
    %c0_3 = arith.constant 0 : index
    %c0_4 = arith.constant 0 : index
    %9 = vector.load %arg2[%c0_3, %c0_4] : memref<4x2xf32, #tpu.memory_space<vmem>>, vector<4x2xf32>
    %10 = tpu.concatenate %5, %8 in 1 : vector<4x1xf32>, vector<4x1xf32> -> vector<4x2xf32>
    %11 = arith.addf %9, %10 : vector<4x2xf32>
    %c0_5 = arith.constant 0 : index
    %c0_6 = arith.constant 0 : index
    %12 = vector.load %arg2[%c0_5, %c0_6] : memref<4x2xf32, #tpu.memory_space<vmem>>, vector<4x2xf32>
    tpu.vector_store %arg2[%c0_5, %c0_6], %11 {strides = array<i32>} : memref<4x2xf32, #tpu.memory_space<vmem>>, vector<4x2xf32>,
    return
  }
  func.func @transform_0(%arg0: i32) -> (i32, i32) {
    %c0_i32 = arith.constant 0 : i32
    %c0_i32_0 = arith.constant 0 : i32
    return %c0_i32, %arg0 : i32, i32
  }
  func.func @transform_1(%arg0: i32) -> (i32, i32) {
    %c0_i32 = arith.constant 0 : i32
    %c0_i32_0 = arith.constant 0 : i32
    %c0_i32_1 = arith.constant 0 : i32
    return %c0_i32, %c0_i32_0 : i32, i32
  }
}

</mosaic_0001>

<bundles_post_ra>
// kernel: tpu_custom_call.1
= control target key start
LH: loop header
LB: loop body
LE: loop exit
PB: predicated region body
PF: predicated region fallthrough
CT: control target
= control target key end

     0   :  { %6 = vsyncpa [#allocation3], 0  ;;  %s434_s0 = inlined_call_operand.hbm [shape: f32[4,512], index: 0, kind: input, shape index: {}]   ;;  %s435_s1 = inlined_call_operand.vmem [shape: f32[4,2], index: 1, kind: output, shape index: {}]  }
   0x1   :  { %8 = vsyncpa [#allocation3 + $0x1], 0  ;;  %s322_s6 = smov 0   ;;  %s324_s7 = smov 0  }
   0x2   :  { %s326_s8 = smov 0   ;;  %s328_s9 = smov 0  }
   0x3 LB: > { %s191_s10 = sadd.s32 4294967295, %s308_s9   ;;  %s342_s11 = sadd.s32 1, %s308_s9   ;;  %s308_s9 = sphi %s328_s9, %s443_s9   ;;  %s304_s8 = sphi %s326_s8, %s442_s8   ;;  %s300_s7 = sphi %s324_s7, %s441_s7   ;;  %s296_s6 = sphi %s322_s6, %s440_s6  }
   0x4   : > { %s18_s12 = ssub.s32 %s308_s9, %s342_s11  ;;  %s21_s13 = sadd.s32 1, %s304_s8 }
   0x5   : > { %p19_p0 = scmp.eq.s32.totalorder %s18_s12, 0  ;;  %p28_p1 = scmp.ne.s32.totalorder %s304_s8, %s300_s7 }
   0x6   : > { %p29_p2 = scmp.eq.s32.totalorder %s308_s9, 0  ;;  %p34_p3 = scmp.ne.s32.totalorder %s300_s7, %s296_s6 }
   0x7   : > { %s352_s14 = scalar_select %p19_p0, %s304_s8, %s21_s13  }
   0x8   : > { %p30_p4 = por %p29_p2, %p28_p1  ;;  %p35_p5 = scmp.eq.s32.totalorder %s191_s10, 0 }
   0x9   : > { %p209_p6 = scmp.lt.s32.totalorder %s308_s9, 2  ;;  %s79_s16 = sand.u32 1, %s304_s8  }
   0xa   : > { %p357_p7 = por %p35_p5, %p34_p3  ;;  %s194_s17 = sshll.u32 %s79_s16, 3 }
   0xb   : > { %s202_s18 = sshll.u32 %s308_s9, 7  ;;  %s83_s22 = scalar_lea.vmem [#allocation2], %s194_s17 }
   0xc   : > { %s366_s21 = scalar_lea.hbm %s434_s0, %s202_s18  ;;  %s91_s23 = sshll.u32 %s83_s22, 4  ;;  %s368_s23 = int_to_ptr.vmem [resolvable:$true] %s91_s23 }
   0xd   : > { %p370_p8 = pnand %p209_p6, %p30_p4  ;;  %s80_s25 = scalar_lea.sflag [#allocation3], %s79_s16 }
   0xe   : > { %s244_s26 = scalar_lea.hbm %s366_s21, 128  ;;  %s249_s29 = scalar_lea.hbm %s434_s0, 256 }
   0xf   : > { %p245_p11 = scmp.ne.s32.totalorder %s366_s21, %s244_s26  ;;  %p246_p12 = pneg %p370_p8 }
  0x10   : > { %p250_p1 = scmp.lt.u32.totalorder %s366_s21, %s434_s0  ;;  %p251_p2 = scmp.lt.u32.totalorder %s249_s29, %s244_s26 }
  0x11   : > { %p247_p13 = pnand %p246_p12, %p245_p11  ;;  %p253_p4 = scmp.lt.u32.totalorder %s244_s26, %s366_s21 }
  0x12   : > { %p252_p3 = por %p251_p2, %p250_p1 }
  0x13   : > { %p248_p0 = pneg %p247_p13 }
  0x14   : > { %p254_p5 = por %p253_p4, %p252_p3 }
  0x16   : > { %p255_p6 = pnand %p254_p5, %p248_p0 }
  0x18   : > { %258 = shalt.err (!%p255_p6)
}
  0x19   : > { %s259_s3 = scalar_lea.vmem %s368_s23, 128  ;;  %s310_s4 = smov [#allocation2]  }
  0x1a   : > { %p260_p11 = scmp.ne.s32.totalorder %s368_s23, %s259_s3  ;;  %s264_s5 = sshll.u32 %s310_s4, 4  ;;  %s265_s5 = int_to_ptr.vmem [resolvable:$false] %s264_s5 }
  0x1b   : > { %s266_s6 = scalar_lea.vmem %s265_s5, 256  ;;  %p267_p10 = scmp.lt.s32.totalorder %s368_s23, %s265_s5 }
  0x1c   : > { %p262_p13 = pnand %p260_p11, %p246_p12  ;;  %p268_p1 = scmp.lt.s32.totalorder %s266_s6, %s259_s3 }
  0x1e   : > { %p263_p9 = pneg %p262_p13  ;;  %p269_p2 = por %p268_p1, %p267_p10 }
  0x20   : > { %p270_p3 = pnand %p269_p2, %p263_p9 }
  0x22   : > { %273 = shalt.err (!%p270_p3)
}
  0x23   : > { %208 = dma.hbm_to_vmem [thread:$0]  (!%p370_p8), %s366_s21, 128, %s368_s23, %s80_s25  }
  0x24   : > { %p438_p0 = scmp.lt.s32.totalorder %s308_s9, 3  ;;  %p439_p4 = scmp.ge.s32.totalorder %s308_s9, 1 }
  0x26   : > { %p97_p12 = pnand %p439_p4, %p438_p0 }
  0x27   : > { %s102_s12 = sand.u32 (!%p97_p12), 1, %s300_s7  }
  0x28   : > { %100 = sbr.rel (%p97_p12) target bundleno = 213 (0xd5), region = 24  ;;  %s198_s13 = sshll.u32 (!%p97_p12), %s102_s12, 3 }
  0x29   : > { %s103_s16 = scalar_lea.sflag (!%p97_p12), [#allocation3], %s102_s12  ;;  %s106_s17 = scalar_lea.vmem (!%p97_p12), [#allocation2], %s198_s13 }
  0x2f   : > { %291 = dma.done.wait (%p357_p7), %s103_s16, 128  }
  0x30   : > { %293 = vsyncadd (%p357_p7), %s103_s16, 4294967168  ;;  %p199_p9 = scmp.ne.s32.totalorder %s191_s10, 0 }
  0x31   : > { %vm125_vm0 = vcmask (!%p199_p9), 11264   ;;  %v311_v0 = vmov (!%p199_p9), 0.0  }
  0x32   : > { %124 = sbr.rel (%p199_p9) target bundleno = 57 (0x39), region = 32  ;;  %126 = vst.msk [vmem:[%s435_s1] sm:$0xf] (!%p199_p9), %vm125_vm0, %v311_v0 }
  0x39 PF: > { %v127_v1 = vld [vmem:[%s106_s17] sm:$0xff]  ;;  %vm131_vm1 = vcmask 1043456   ;;  %vm147_vm2 = vcmask 7168   ;;  %vm150_vm3 = vcmask 11264  }
  0x3a   : > { %v129_v2 = vcombine.high %v127_v1, %v127_v1  ;;  %v132_v3 = vsel %vm131_vm1, %v127_v1, 0.0  ;;  %v137_v4 = vmul.f32 %v127_v1, %v127_v1  ;;  %v146_v12 = vld [vmem:[%s435_s1] sm:$0xf] }
  0x3c   : > { %v133_v5 = vsel %vm131_vm1, %v129_v2, 0.0  ;;  %v139_v6 = vcombine.high %v137_v4, %v137_v4  ;;  %v141_v7 = vsel %vm131_vm1, %v137_v4, 0.0 }
  0x3d   : > { %v134_v8 = vadd.f32 %v133_v5, %v132_v3 }
  0x3e   : > { %v142_v9 = vsel %vm131_vm1, %v139_v6, 0.0 }
  0x3f   : > { %135 = vadd.xlane.f32.xlu0 %v134_v8  ;;  %v143_v10 = vadd.f32 %v142_v9, %v141_v7 }
  0x43   : > { %144 = vadd.xlane.f32.xlu0 %v143_v10 }
  0xcc   : > { %v136_v11 = vpop.xlane.xlu0 %135 }
  0xd0   : > { %v145_v13 = vpop.xlane.xlu0 %144 }
  0xd1   : > { %v148_v14 = vsel %vm147_vm2, %v136_v11, %v145_v13 }
  0xd2   : > { %v149_v15 = vadd.f32 %v148_v14, %v146_v12 }
  0xd4   : > { %151 = vst.msk [vmem:[%s435_s1] sm:$0xf] %vm150_vm3, %v149_v15 }
  0xd5 PF: > { %p11_p7 = scmp.ge.s32.totalorder %s342_s11, 4   ;;  %s440_s6 = smov %s300_s7 }
  0xd6   : > { %s441_s7 = smov %s304_s8  ;;  %s442_s8 = smov %s352_s14 }
  0xd7   : > { %s443_s9 = smov %s342_s11  ;;  %13 = sbr.rel (!%p11_p7) target bundleno = 3 (0x3), region = 64 }
  0xde   :  { %163 = vsyncpa [#allocation3], 1 }
  0xdf   :  { %165 = vsyncpa [#allocation3 + $0x1], 1 }

</bundles_post_ra>
